<compile_context>
chip_gen: v6e
topology: v6e:2x2x1
jax: 0.10.0
libtpu: 0.0.40
codegen_flags: <defaults>
</compile_context>

<pallas_src>
import functools

import jax
import jax.numpy as jnp
from jax.experimental import pallas as pl
from jax.experimental.pallas import tpu as pltpu


# ----------------------------- Pallas kernels ------------------------------

def _deconv_kernel(w_ref, b_ref, x_ref, y_ref):
    """ConvTranspose2d(k=2, s=2) as a CM GEMM, one image per grid step.

    x_ref: (1, Cin, H*W) f32; w_ref: (4*Cout, Cin); b_ref: (4*Cout, 1).
    Output row t*Cout + o holds tap (ty, tx) = (t // 2, t % 2) of channel o,
    i.e. the space-to-depth packing of the upsampled image.
    """
    y = jnp.dot(w_ref[...], x_ref[0], preferred_element_type=jnp.float32)
    y_ref[0] = (y + b_ref[...]).astype(y_ref.dtype)


def _conv3x3_relu_stats_kernel(w_ref, b_ref, m_ref, x_ref, y_ref, s_ref, *,
                               wf, l_out):
    """Valid 3x3 conv + bias + ReLU + per-channel batch statistics.

    One image per grid step, "full-frame flat CM" layout (channels on
    sublanes, flattened Hf*Wf fine frame on lanes).  The nine taps are static
    lane-shifted slices of the in-VMEM tile (in-kernel im2col).  Only the
    first l_out lanes are computed (their taps stay inside this image); the
    remaining tail lanes are zero-filled.  Garbage (wrap-around) positions are
    excluded from the statistics via the precomputed validity mask.
    """
    cout = y_ref.shape[1]
    sf = y_ref.shape[2]
    x = x_ref[0].astype(jnp.float32)                       # (Cin, Sf) f32

    acc = jnp.zeros((cout, l_out), jnp.float32)
    for k in range(9):                                     # unrolled taps
        off = (k // 3) * wf + (k % 3)                      # static lane offset
        acc = acc + jnp.dot(w_ref[k], x[:, off:off + l_out],
                            preferred_element_type=jnp.float32)
    y = jnp.maximum(acc + b_ref[...], 0.0)                 # fused bias + ReLU

    y_ref[0, :, :l_out] = y.astype(y_ref.dtype)
    y_ref[0, :, l_out:] = jnp.zeros((cout, sf - l_out), y_ref.dtype)

    # Per-image partial batch statistics (f32, garbage positions masked).
    m = m_ref[...][:, :l_out]                              # (1, l_out)
    ym = jnp.where(m > 0.0, y, 0.0)
    part = jnp.concatenate(
        [jnp.sum(ym, axis=1, keepdims=True),
         jnp.sum(ym * ym, axis=1, keepdims=True)], axis=0)  # (2*Cout, 1)
    s_ref[0] = jnp.broadcast_to(part, (2 * cout, 128))


# ------------------------------ Pallas wrappers -----------------------------

def _deconv(w4, b4, x_flat):
    n, cin, hw = x_flat.shape
    co4 = w4.shape[0]
    return pl.pallas_call(
        _deconv_kernel,
        out_shape=jax.ShapeDtypeStruct((n, co4, hw), jnp.bfloat16),
        grid=(n,),
        in_specs=[pl.BlockSpec((co4, cin), lambda i: (0, 0)),
                  pl.BlockSpec((co4, 1), lambda i: (0, 0)),
                  pl.BlockSpec((1, cin, hw), lambda i: (i, 0, 0))],
        out_specs=pl.BlockSpec((1, co4, hw), lambda i: (i, 0, 0)),
        compiler_params=pltpu.CompilerParams(
            dimension_semantics=("parallel",)),
    )(w4, b4, x_flat)


def _conv3x3_relu_stats(w9, b, mask, x_in, wf):
    n, cin, sf = x_in.shape
    cout = w9.shape[1]
    l_out = sf - (2 * wf + 2)     # lanes whose taps stay inside this image
    y, st = pl.pallas_call(
        functools.partial(_conv3x3_relu_stats_kernel, wf=wf, l_out=l_out),
        out_shape=(jax.ShapeDtypeStruct((n, cout, sf), jnp.bfloat16),
                   jax.ShapeDtypeStruct((n, 2 * cout, 128), jnp.float32)),
        grid=(n,),
        in_specs=[pl.BlockSpec((9, cout, cin), lambda i: (0, 0, 0)),
                  pl.BlockSpec((cout, 1), lambda i: (0, 0)),
                  pl.BlockSpec((1, sf), lambda i: (0, 0)),
                  pl.BlockSpec((1, cin, sf), lambda i: (i, 0, 0))],
        out_specs=(pl.BlockSpec((1, cout, sf), lambda i: (i, 0, 0)),
                   pl.BlockSpec((1, 2 * cout, 128), lambda i: (i, 0, 0))),
        # Per-image partial stats => no cross-step accumulator => the grid
        # axis stays "parallel" (megacore-shardable on v7x).
        compiler_params=pltpu.CompilerParams(
            dimension_semantics=("parallel",)),
    )(w9, b, mask, x_in)
    stats = st[:, :, 0].sum(axis=0)                        # (2*Cout,)
    return y, stats


# ------------------------------ XLA glue ------------------------------------

def _valid_mask(hf, wf, margin):
    row = jnp.arange(hf, dtype=jnp.int32)[:, None]
    col = jnp.arange(wf, dtype=jnp.int32)[None, :]
    m = (row < hf - margin) & (col < wf - margin)
    return m.astype(jnp.float32).reshape(1, hf * wf)


# ------------------------------ parameters ---------------------------------

def init_upstep_params(key, in_c, out_c):
    """Deterministic init mirroring upStep.__init__ shapes (PyTorch layouts)."""
    ks = jax.random.split(key, 6)

    def u(k, shape, fan_in):
        bound = 1.0 / jnp.sqrt(jnp.float32(fan_in))
        return jax.random.uniform(k, shape, jnp.float32, -bound, bound)

    return dict(
        # ConvTranspose2d(inC, outC, 2, stride=2): weight (inC, outC, 2, 2)
        up_w=u(ks[0], (in_c, out_c, 2, 2), in_c * 4),
        up_b=u(ks[1], (out_c,), in_c * 4),
        # Conv2d(inC, outC, 3)
        c1_w=u(ks[2], (out_c, in_c, 3, 3), in_c * 9),
        c1_b=u(ks[3], (out_c,), in_c * 9),
        # Conv2d(outC, outC, 3)
        c2_w=u(ks[4], (out_c, out_c, 3, 3), out_c * 9),
        c2_b=u(ks[5], (out_c,), out_c * 9),
        # BatchNorm2d defaults
        bn1_g=jnp.ones((out_c,), jnp.float32), bn1_b=jnp.zeros((out_c,), jnp.float32),
        bn2_g=jnp.ones((out_c,), jnp.float32), bn2_b=jnp.zeros((out_c,), jnp.float32),
    )


# ------------------------------ forward pass --------------------------------

@jax.jit
def upstep_forward(params, x_nchw, xdown_nchw):
    n, in_c, h, w = x_nchw.shape
    out_c = params["up_w"].shape[1]
    hf, wf = 2 * h, 2 * w
    sf = hf * wf
    eps = 1e-5

    # --- ConvTranspose2d(inC, outC, 2, stride=2) as a Pallas CM GEMM ---------
    x_flat = x_nchw.reshape(n, in_c, h * w)
    w_up = jnp.transpose(params["up_w"], (2, 3, 1, 0)).reshape(4 * out_c, in_c)
    b_up = jnp.tile(params["up_b"], 4).reshape(4 * out_c, 1)
    y4 = _deconv(w_up, b_up, x_flat)            # (N, 4*outC, H*W) bf16

    # --- conv1 input: depth-to-space of y4 + center-crop skip + concat -------
    # Single fused XLA copy pass in bf16; no patches / pad passes anywhere.
    up = (y4.reshape(n, 2, 2, out_c, h, w)
             .transpose(0, 3, 4, 1, 5, 2)
             .reshape(n, out_c, sf))
    c = (xdown_nchw.shape[2] - hf) // 2
    skip = xdown_nchw[:, :, c:xdown_nchw.shape[2] - c,
                      c:xdown_nchw.shape[3] - c]
    skip = skip.reshape(n, out_c, sf).astype(jnp.bfloat16)
    cat = jnp.concatenate([skip, up], axis=1)   # (N, inC, Sf), torch cat order
    # TODO(synk): fusing deconv + crop/concat + conv1 into one pallas_call
    #             would remove this last XLA pass over the upsampled tensor.

    mask1 = _valid_mask(hf, wf, 2)              # conv1-valid fine positions
    mask2 = _valid_mask(hf, wf, 4)              # conv2-valid fine positions

    # --- Conv3x3 #1 + ReLU (+ in-kernel batch-stat accumulation) -------------
    w1 = jnp.transpose(params["c1_w"], (2, 3, 0, 1)).reshape(9, out_c, in_c)
    b1 = params["c1_b"].reshape(out_c, 1)
    h1, s1 = _conv3x3_relu_stats(w1, b1, mask1, cat, wf)

    # --- BN1 (training-mode batch stats, biased var) folded into conv2 -------
    cnt1 = n * (hf - 2) * (wf - 2)
    mean1 = s1[:out_c] / cnt1
    var1 = s1[out_c:] / cnt1 - mean1 * mean1
    scale1 = params["bn1_g"] * jax.lax.rsqrt(var1 + eps)
    shift1 = params["bn1_b"] - mean1 * scale1

    w2 = jnp.transpose(params["c2_w"], (2, 3, 0, 1)).reshape(9, out_c, out_c)
    w2f = w2 * scale1[None, None, :]
    b2f = (params["c2_b"]
           + jnp.einsum("ocij,c->o", params["c2_w"], shift1)).reshape(out_c, 1)

    # --- Conv3x3 #2 + ReLU (+ stats) ------------------------------------------
    h2, s2 = _conv3x3_relu_stats(w2f, b2f, mask2, h1, wf)

    # --- BN2 folded into the final crop / layout copy (no extra Pallas pass) --
    cnt2 = n * (hf - 4) * (wf - 4)
    mean2 = s2[:out_c] / cnt2
    var2 = s2[out_c:] / cnt2 - mean2 * mean2
    scale2 = params["bn2_g"] * jax.lax.rsqrt(var2 + eps)
    shift2 = params["bn2_b"] - mean2 * scale2

    out = h2.astype(jnp.float32).reshape(n, out_c, hf, wf)[:, :, :hf - 4,
                                                           :wf - 4]
    return out * scale2[None, :, None, None] + shift2[None, :, None, None]


# --------------------------------- main --------------------------------------

if __name__ == "__main__":
    key = jax.random.PRNGKey(0)
    k_p, k_x, k_d = jax.random.split(key, 3)

    in_c, out_c = 8, 4                       # U-Net style: inC == 2 * outC
    params = init_upstep_params(k_p, in_c, out_c)

    # NCHW inputs consistent with the module (skip is larger spatially and has
    # outC channels, so the concat yields inC channels).
    x = jax.random.normal(k_x, (2, in_c, 8, 8), jnp.float32)
    x_down = jax.random.normal(k_d, (2, out_c, 20, 20), jnp.float32)

    out = upstep_forward(params, x, x_down)
    jax.block_until_ready(out)
    assert out.shape == (2, out_c, 12, 12), out.shape
    assert bool(jnp.isfinite(out).all())
    print("KERNEL_OK")
</pallas_src>

<mosaic_0001>
module attributes {stable_mosaic.version = 11 : i64} {
  func.func @_deconv_kernel(%arg0: i32, %arg1: memref<16x8xf32, #tpu.memory_space<vmem>>, %arg2: memref<16x1xf32, #tpu.memory_space<vmem>>, %arg3: memref<1x8x64xf32, #tpu.memory_space<vmem>>, %arg4: memref<1x16x64xbf16, #tpu.memory_space<vmem>>) attributes {dimension_semantics = [#tpu.dimension_semantics<parallel>], iteration_bounds = array<i64: 2>, scalar_prefetch = 0 : i64, scratch_operands = 0 : i64, tpu.core_type = #tpu.core_type<tc>, window_params = [{pipeline_mode = #tpu.pipeline_mode<synchronous>, transform_indices = @transform_0, window_bounds = array<i64: 16, 8>}, {pipeline_mode = #tpu.pipeline_mode<synchronous>, transform_indices = @transform_1, window_bounds = array<i64: 16, 1>}, {transform_indices = @transform_2, window_bounds = array<i64: 1, 8, 64>}, {transform_indices = @transform_3, window_bounds = array<i64: 1, 16, 64>}]} {
    %c0 = arith.constant 0 : index
    %c0_0 = arith.constant 0 : index
    %0 = vector.load %arg1[%c0, %c0_0] : memref<16x8xf32, #tpu.memory_space<vmem>>, vector<16x8xf32>
    %c0_1 = arith.constant 0 : index
    %c0_2 = arith.constant 0 : index
    %c0_3 = arith.constant 0 : index
    %1 = vector.load %arg3[%c0_1, %c0_2, %c0_3] : memref<1x8x64xf32, #tpu.memory_space<vmem>>, vector<1x8x64xf32>
    %2 = vector.shape_cast %1 : vector<1x8x64xf32> to vector<8x64xf32>
    %cst = arith.constant dense<0.000000e+00> : vector<16x64xf32>
    %3 = tpu.matmul %0, %2, %cst {dimension_numbers = #tpu.dot_dimension_numbers<[1], [0], [0], [1], [0, 0, 1, 1], [], []>} : vector<16x8xf32>, vector<8x64xf32>, vector<16x64xf32> -> vector<16x64xf32>
    %c0_4 = arith.constant 0 : index
    %c0_5 = arith.constant 0 : index
    %4 = vector.load %arg2[%c0_4, %c0_5] : memref<16x1xf32, #tpu.memory_space<vmem>>, vector<16x1xf32>
    %5 = vector.broadcast %4 : vector<16x1xf32> to vector<16x64xf32>
    %6 = arith.addf %3, %5 : vector<16x64xf32>
    %7 = arith.truncf %6 : vector<16x64xf32> to vector<16x64xbf16>
    %c0_6 = arith.constant 0 : index
    %c0_7 = arith.constant 0 : index
    %c0_8 = arith.constant 0 : index
    %8 = vector.load %arg4[%c0_6, %c0_7, %c0_8] : memref<1x16x64xbf16, #tpu.memory_space<vmem>>, vector<1x16x64xbf16>
    %9 = vector.shape_cast %8 : vector<1x16x64xbf16> to vector<16x64xbf16>
    %10 = vector.shape_cast %7 : vector<16x64xbf16> to vector<1x16x64xbf16>
    tpu.vector_store %arg4[%c0_6, %c0_7, %c0_8], %10 {strides = array<i32>} : memref<1x16x64xbf16, #tpu.memory_space<vmem>>, vector<1x16x64xbf16>,
    return
  }
  func.func @transform_0(%arg0: i32) -> (i32, i32) {
    %c0_i32 = arith.constant 0 : i32
    %c0_i32_0 = arith.constant 0 : i32
    %c0_i32_1 = arith.constant 0 : i32
    return %c0_i32, %c0_i32_0 : i32, i32
  }
  func.func @transform_1(%arg0: i32) -> (i32, i32) {
    %c0_i32 = arith.constant 0 : i32
    %c0_i32_0 = arith.constant 0 : i32
    %c0_i32_1 = arith.constant 0 : i32
    return %c0_i32, %c0_i32_0 : i32, i32
  }
  func.func @transform_2(%arg0: i32) -> (i32, i32, i32) {
    %c0_i32 = arith.constant 0 : i32
    %c0_i32_0 = arith.constant 0 : i32
    %c0_i32_1 = arith.constant 0 : i32
    return %arg0, %c0_i32, %c0_i32_0 : i32, i32, i32
  }
  func.func @transform_3(%arg0: i32) -> (i32, i32, i32) {
    %c0_i32 = arith.constant 0 : i32
    %c0_i32_0 = arith.constant 0 : i32
    %c0_i32_1 = arith.constant 0 : i32
    return %arg0, %c0_i32, %c0_i32_0 : i32, i32, i32
  }
}

module attributes {stable_mosaic.version = 11 : i64} {
  func.func @_conv3x3_relu_stats_kernel(%arg0: i32, %arg1: memref<9x4x8xf32, #tpu.memory_space<vmem>>, %arg2: memref<4x1xf32, #tpu.memory_space<vmem>>, %arg3: memref<1x256xf32, #tpu.memory_space<vmem>>, %arg4: memref<1x8x256xbf16, #tpu.memory_space<vmem>>, %arg5: memref<1x4x256xbf16, #tpu.memory_space<vmem>>, %arg6: memref<1x8x128xf32, #tpu.memory_space<vmem>>) attributes {dimension_semantics = [#tpu.dimension_semantics<parallel>], iteration_bounds = array<i64: 2>, scalar_prefetch = 0 : i64, scratch_operands = 0 : i64, tpu.core_type = #tpu.core_type<tc>, window_params = [{pipeline_mode = #tpu.pipeline_mode<synchronous>, transform_indices = @transform_0, window_bounds = array<i64: 9, 4, 8>}, {pipeline_mode = #tpu.pipeline_mode<synchronous>, transform_indices = @transform_1, window_bounds = array<i64: 4, 1>}, {pipeline_mode = #tpu.pipeline_mode<synchronous>, transform_indices = @transform_2, window_bounds = array<i64: 1, 256>}, {transform_indices = @transform_3, window_bounds = array<i64: 1, 8, 256>}, {transform_indices = @transform_4, window_bounds = array<i64: 1, 4, 256>}, {transform_indices = @transform_5, window_bounds = array<i64: 1, 8, 128>}]} {
    %c0 = arith.constant 0 : index
    %c0_0 = arith.constant 0 : index
    %c0_1 = arith.constant 0 : index
    %0 = vector.load %arg4[%c0, %c0_0, %c0_1] : memref<1x8x256xbf16, #tpu.memory_space<vmem>>, vector<1x8x256xbf16>
    %1 = vector.shape_cast %0 : vector<1x8x256xbf16> to vector<8x256xbf16>
    %2 = arith.extf %1 : vector<8x256xbf16> to vector<8x256xf32>
    %cst = arith.constant 0.000000e+00 : f32
    %3 = vector.broadcast %cst : f32 to vector<4x222xf32>
    %c0_2 = arith.constant 0 : index
    %c0_3 = arith.constant 0 : index
    %c0_4 = arith.constant 0 : index
    %4 = vector.load %arg1[%c0_2, %c0_3, %c0_4] : memref<9x4x8xf32, #tpu.memory_space<vmem>>, vector<1x4x8xf32>
    %5 = vector.shape_cast %4 : vector<1x4x8xf32> to vector<4x8xf32>
    %6 = vector.extract_strided_slice %2 {offsets = [0, 0], sizes = [8, 222], strides = [1, 1]} : vector<8x256xf32> to vector<8x222xf32>
    %cst_5 = arith.constant dense<0.000000e+00> : vector<4x222xf32>
    %7 = tpu.matmul %5, %6, %cst_5 {dimension_numbers = #tpu.dot_dimension_numbers<[1], [0], [0], [1], [0, 0, 1, 1], [], []>} : vector<4x8xf32>, vector<8x222xf32>, vector<4x222xf32> -> vector<4x222xf32>
    %8 = arith.addf %3, %7 : vector<4x222xf32>
    %c1 = arith.constant 1 : index
    %c0_6 = arith.constant 0 : index
    %c0_7 = arith.constant 0 : index
    %9 = vector.load %arg1[%c1, %c0_6, %c0_7] : memref<9x4x8xf32, #tpu.memory_space<vmem>>, vector<1x4x8xf32>
    %10 = vector.shape_cast %9 : vector<1x4x8xf32> to vector<4x8xf32>
    %11 = vector.extract_strided_slice %2 {offsets = [0, 1], sizes = [8, 222], strides = [1, 1]} : vector<8x256xf32> to vector<8x222xf32>
    %cst_8 = arith.constant dense<0.000000e+00> : vector<4x222xf32>
    %12 = tpu.matmul %10, %11, %cst_8 {dimension_numbers = #tpu.dot_dimension_numbers<[1], [0], [0], [1], [0, 0, 1, 1], [], []>} : vector<4x8xf32>, vector<8x222xf32>, vector<4x222xf32> -> vector<4x222xf32>
    %13 = arith.addf %8, %12 : vector<4x222xf32>
    %c2 = arith.constant 2 : index
    %c0_9 = arith.constant 0 : index
    %c0_10 = arith.constant 0 : index
    %14 = vector.load %arg1[%c2, %c0_9, %c0_10] : memref<9x4x8xf32, #tpu.memory_space<vmem>>, vector<1x4x8xf32>
    %15 = vector.shape_cast %14 : vector<1x4x8xf32> to vector<4x8xf32>
    %16 = vector.extract_strided_slice %2 {offsets = [0, 2], sizes = [8, 222], strides = [1, 1]} : vector<8x256xf32> to vector<8x222xf32>
    %cst_11 = arith.constant dense<0.000000e+00> : vector<4x222xf32>
    %17 = tpu.matmul %15, %16, %cst_11 {dimension_numbers = #tpu.dot_dimension_numbers<[1], [0], [0], [1], [0, 0, 1, 1], [], []>} : vector<4x8xf32>, vector<8x222xf32>, vector<4x222xf32> -> vector<4x222xf32>
    %18 = arith.addf %13, %17 : vector<4x222xf32>
    %c3 = arith.constant 3 : index
    %c0_12 = arith.constant 0 : index
    %c0_13 = arith.constant 0 : index
    %19 = vector.load %arg1[%c3, %c0_12, %c0_13] : memref<9x4x8xf32, #tpu.memory_space<vmem>>, vector<1x4x8xf32>
    %20 = vector.shape_cast %19 : vector<1x4x8xf32> to vector<4x8xf32>
    %21 = vector.extract_strided_slice %2 {offsets = [0, 16], sizes = [8, 222], strides = [1, 1]} : vector<8x256xf32> to vector<8x222xf32>
    %cst_14 = arith.constant dense<0.000000e+00> : vector<4x222xf32>
    %22 = tpu.matmul %20, %21, %cst_14 {dimension_numbers = #tpu.dot_dimension_numbers<[1], [0], [0], [1], [0, 0, 1, 1], [], []>} : vector<4x8xf32>, vector<8x222xf32>, vector<4x222xf32> -> vector<4x222xf32>
    %23 = arith.addf %18, %22 : vector<4x222xf32>
    %c4 = arith.constant 4 : index
    %c0_15 = arith.constant 0 : index
    %c0_16 = arith.constant 0 : index
    %24 = vector.load %arg1[%c4, %c0_15, %c0_16] : memref<9x4x8xf32, #tpu.memory_space<vmem>>, vector<1x4x8xf32>
    %25 = vector.shape_cast %24 : vector<1x4x8xf32> to vector<4x8xf32>
    %26 = vector.extract_strided_slice %2 {offsets = [0, 17], sizes = [8, 222], strides = [1, 1]} : vector<8x256xf32> to vector<8x222xf32>
    %cst_17 = arith.constant dense<0.000000e+00> : vector<4x222xf32>
    %27 = tpu.matmul %25, %26, %cst_17 {dimension_numbers = #tpu.dot_dimension_numbers<[1], [0], [0], [1], [0, 0, 1, 1], [], []>} : vector<4x8xf32>, vector<8x222xf32>, vector<4x222xf32> -> vector<4x222xf32>
    %28 = arith.addf %23, %27 : vector<4x222xf32>
    %c5 = arith.constant 5 : index
    %c0_18 = arith.constant 0 : index
    %c0_19 = arith.constant 0 : index
    %29 = vector.load %arg1[%c5, %c0_18, %c0_19] : memref<9x4x8xf32, #tpu.memory_space<vmem>>, vector<1x4x8xf32>
    %30 = vector.shape_cast %29 : vector<1x4x8xf32> to vector<4x8xf32>
    %31 = vector.extract_strided_slice %2 {offsets = [0, 18], sizes = [8, 222], strides = [1, 1]} : vector<8x256xf32> to vector<8x222xf32>
    %cst_20 = arith.constant dense<0.000000e+00> : vector<4x222xf32>
    %32 = tpu.matmul %30, %31, %cst_20 {dimension_numbers = #tpu.dot_dimension_numbers<[1], [0], [0], [1], [0, 0, 1, 1], [], []>} : vector<4x8xf32>, vector<8x222xf32>, vector<4x222xf32> -> vector<4x222xf32>
    %33 = arith.addf %28, %32 : vector<4x222xf32>
    %c6 = arith.constant 6 : index
    %c0_21 = arith.constant 0 : index
    %c0_22 = arith.constant 0 : index
    %34 = vector.load %arg1[%c6, %c0_21, %c0_22] : memref<9x4x8xf32, #tpu.memory_space<vmem>>, vector<1x4x8xf32>
    %35 = vector.shape_cast %34 : vector<1x4x8xf32> to vector<4x8xf32>
    %36 = vector.extract_strided_slice %2 {offsets = [0, 32], sizes = [8, 222], strides = [1, 1]} : vector<8x256xf32> to vector<8x222xf32>
    %cst_23 = arith.constant dense<0.000000e+00> : vector<4x222xf32>
    %37 = tpu.matmul %35, %36, %cst_23 {dimension_numbers = #tpu.dot_dimension_numbers<[1], [0], [0], [1], [0, 0, 1, 1], [], []>} : vector<4x8xf32>, vector<8x222xf32>, vector<4x222xf32> -> vector<4x222xf32>
    %38 = arith.addf %33, %37 : vector<4x222xf32>
    %c7 = arith.constant 7 : index
    %c0_24 = arith.constant 0 : index
    %c0_25 = arith.constant 0 : index
    %39 = vector.load %arg1[%c7, %c0_24, %c0_25] : memref<9x4x8xf32, #tpu.memory_space<vmem>>, vector<1x4x8xf32>
    %40 = vector.shape_cast %39 : vector<1x4x8xf32> to vector<4x8xf32>
    %41 = vector.extract_strided_slice %2 {offsets = [0, 33], sizes = [8, 222], strides = [1, 1]} : vector<8x256xf32> to vector<8x222xf32>
    %cst_26 = arith.constant dense<0.000000e+00> : vector<4x222xf32>
    %42 = tpu.matmul %40, %41, %cst_26 {dimension_numbers = #tpu.dot_dimension_numbers<[1], [0], [0], [1], [0, 0, 1, 1], [], []>} : vector<4x8xf32>, vector<8x222xf32>, vector<4x222xf32> -> vector<4x222xf32>
    %43 = arith.addf %38, %42 : vector<4x222xf32>
    %c8 = arith.constant 8 : index
    %c0_27 = arith.constant 0 : index
    %c0_28 = arith.constant 0 : index
    %44 = vector.load %arg1[%c8, %c0_27, %c0_28] : memref<9x4x8xf32, #tpu.memory_space<vmem>>, vector<1x4x8xf32>
    %45 = vector.shape_cast %44 : vector<1x4x8xf32> to vector<4x8xf32>
    %46 = vector.extract_strided_slice %2 {offsets = [0, 34], sizes = [8, 222], strides = [1, 1]} : vector<8x256xf32> to vector<8x222xf32>
    %cst_29 = arith.constant dense<0.000000e+00> : vector<4x222xf32>
    %47 = tpu.matmul %45, %46, %cst_29 {dimension_numbers = #tpu.dot_dimension_numbers<[1], [0], [0], [1], [0, 0, 1, 1], [], []>} : vector<4x8xf32>, vector<8x222xf32>, vector<4x222xf32> -> vector<4x222xf32>
    %48 = arith.addf %43, %47 : vector<4x222xf32>
    %c0_30 = arith.constant 0 : index
    %c0_31 = arith.constant 0 : index
    %49 = vector.load %arg2[%c0_30, %c0_31] : memref<4x1xf32, #tpu.memory_space<vmem>>, vector<4x1xf32>
    %50 = vector.broadcast %49 : vector<4x1xf32> to vector<4x222xf32>
    %51 = arith.addf %48, %50 : vector<4x222xf32>
    %cst_32 = arith.constant 0.000000e+00 : f32
    %52 = vector.broadcast %cst_32 : f32 to vector<4x222xf32>
    %53 = arith.maximumf %51, %52 : vector<4x222xf32>
    %54 = arith.truncf %53 : vector<4x222xf32> to vector<4x222xbf16>
    %c0_33 = arith.constant 0 : index
    %c0_34 = arith.constant 0 : index
    %c0_35 = arith.constant 0 : index
    %55 = vector.load %arg5[%c0_33, %c0_34, %c0_35] : memref<1x4x256xbf16, #tpu.memory_space<vmem>>, vector<1x4x222xbf16>
    %56 = vector.shape_cast %55 : vector<1x4x222xbf16> to vector<4x222xbf16>
    %57 = vector.shape_cast %54 : vector<4x222xbf16> to vector<1x4x222xbf16>
    tpu.vector_store %arg5[%c0_33, %c0_34, %c0_35], %57 {strides = array<i32>} : memref<1x4x256xbf16, #tpu.memory_space<vmem>>, vector<1x4x222xbf16>,
    %cst_36 = arith.constant 0.000000e+00 : bf16
    %58 = vector.broadcast %cst_36 : bf16 to vector<4x34xbf16>
    %c0_37 = arith.constant 0 : index
    %c0_38 = arith.constant 0 : index
    %c222 = arith.constant 222 : index
    %59 = vector.load %arg5[%c0_37, %c0_38, %c222] : memref<1x4x256xbf16, #tpu.memory_space<vmem>>, vector<1x4x34xbf16>
    %60 = vector.shape_cast %59 : vector<1x4x34xbf16> to vector<4x34xbf16>
    %61 = vector.shape_cast %58 : vector<4x34xbf16> to vector<1x4x34xbf16>
    tpu.vector_store %arg5[%c0_37, %c0_38, %c222], %61 {strides = array<i32>} : memref<1x4x256xbf16, #tpu.memory_space<vmem>>, vector<1x4x34xbf16>,
    %c0_39 = arith.constant 0 : index
    %c0_40 = arith.constant 0 : index
    %62 = vector.load %arg3[%c0_39, %c0_40] : memref<1x256xf32, #tpu.memory_space<vmem>>, vector<1x256xf32>
    %63 = vector.extract_strided_slice %62 {offsets = [0, 0], sizes = [1, 222], strides = [1, 1]} : vector<1x256xf32> to vector<1x222xf32>
    %cst_41 = arith.constant 0.000000e+00 : f32
    %64 = vector.broadcast %cst_41 : f32 to vector<1x222xf32>
    %65 = arith.cmpf ogt, %63, %64 : vector<1x222xf32>
    %cst_42 = arith.constant 0.000000e+00 : f32
    %66 = vector.shape_cast %65 : vector<1x222xi1> to vector<1x222xi1>
    %67 = vector.broadcast %66 : vector<1x222xi1> to vector<4x222xi1>
    %68 = vector.broadcast %cst_42 : f32 to vector<4x222xf32>
    %69 = arith.select %67, %53, %68 : vector<4x222xi1>, vector<4x222xf32>
    %cst_43 = arith.constant dense<0.000000e+00> : vector<4xf32>
    %70 = vector.multi_reduction <add>, %69, %cst_43 [1] : vector<4x222xf32> to vector<4xf32>
    %71 = vector.shape_cast %70 : vector<4xf32> to vector<4x1xf32>
    %72 = arith.mulf %69, %69 : vector<4x222xf32>
    %cst_44 = arith.constant dense<0.000000e+00> : vector<4xf32>
    %73 = vector.multi_reduction <add>, %72, %cst_44 [1] : vector<4x222xf32> to vector<4xf32>
    %74 = vector.shape_cast %73 : vector<4xf32> to vector<4x1xf32>
    %75 = tpu.concatenate %71, %74 in 0 : vector<4x1xf32>, vector<4x1xf32> -> vector<8x1xf32>
    %76 = vector.shape_cast %75 : vector<8x1xf32> to vector<8x1xf32>
    %77 = vector.broadcast %76 : vector<8x1xf32> to vector<8x128xf32>
    %c0_45 = arith.constant 0 : index
    %c0_46 = arith.constant 0 : index
    %c0_47 = arith.constant 0 : index
    %78 = vector.load %arg6[%c0_45, %c0_46, %c0_47] : memref<1x8x128xf32, #tpu.memory_space<vmem>>, vector<1x8x128xf32>
    %79 = vector.shape_cast %78 : vector<1x8x128xf32> to vector<8x128xf32>
    %80 = vector.shape_cast %77 : vector<8x128xf32> to vector<1x8x128xf32>
    tpu.vector_store %arg6[%c0_45, %c0_46, %c0_47], %80 {strides = array<i32>} : memref<1x8x128xf32, #tpu.memory_space<vmem>>, vector<1x8x128xf32>,
    return
  }
  func.func @transform_0(%arg0: i32) -> (i32, i32, i32) {
    %c0_i32 = arith.constant 0 : i32
    %c0_i32_0 = arith.constant 0 : i32
    %c0_i32_1 = arith.constant 0 : i32
    %c0_i32_2 = arith.constant 0 : i32
    return %c0_i32, %c0_i32_0, %c0_i32_1 : i32, i32, i32
  }
  func.func @transform_1(%arg0: i32) -> (i32, i32) {
    %c0_i32 = arith.constant 0 : i32
    %c0_i32_0 = arith.constant 0 : i32
    %c0_i32_1 = arith.constant 0 : i32
    return %c0_i32, %c0_i32_0 : i32, i32
  }
  func.func @transform_2(%arg0: i32) -> (i32, i32) {
    %c0_i32 = arith.constant 0 : i32
    %c0_i32_0 = arith.constant 0 : i32
    %c0_i32_1 = arith.constant 0 : i32
    return %c0_i32, %c0_i32_0 : i32, i32
  }
  func.func @transform_3(%arg0: i32) -> (i32, i32, i32) {
    %c0_i32 = arith.constant 0 : i32
    %c0_i32_0 = arith.constant 0 : i32
    %c0_i32_1 = arith.constant 0 : i32
    return %arg0, %c0_i32, %c0_i32_0 : i32, i32, i32
  }
  func.func @transform_4(%arg0: i32) -> (i32, i32, i32) {
    %c0_i32 = arith.constant 0 : i32
    %c0_i32_0 = arith.constant 0 : i32
    %c0_i32_1 = arith.constant 0 : i32
    return %arg0, %c0_i32, %c0_i32_0 : i32, i32, i32
  }
  func.func @transform_5(%arg0: i32) -> (i32, i32, i32) {
    %c0_i32 = arith.constant 0 : i32
    %c0_i32_0 = arith.constant 0 : i32
    %c0_i32_1 = arith.constant 0 : i32
    return %arg0, %c0_i32, %c0_i32_0 : i32, i32, i32
  }
}

module attributes {stable_mosaic.version = 11 : i64} {
  func.func @_conv3x3_relu_stats_kernel(%arg0: i32, %arg1: memref<9x4x4xf32, #tpu.memory_space<vmem>>, %arg2: memref<4x1xf32, #tpu.memory_space<vmem>>, %arg3: memref<1x256xf32, #tpu.memory_space<vmem>>, %arg4: memref<1x4x256xbf16, #tpu.memory_space<vmem>>, %arg5: memref<1x4x256xbf16, #tpu.memory_space<vmem>>, %arg6: memref<1x8x128xf32, #tpu.memory_space<vmem>>) attributes {dimension_semantics = [#tpu.dimension_semantics<parallel>], iteration_bounds = array<i64: 2>, scalar_prefetch = 0 : i64, scratch_operands = 0 : i64, tpu.core_type = #tpu.core_type<tc>, window_params = [{pipeline_mode = #tpu.pipeline_mode<synchronous>, transform_indices = @transform_0, window_bounds = array<i64: 9, 4, 4>}, {pipeline_mode = #tpu.pipeline_mode<synchronous>, transform_indices = @transform_1, window_bounds = array<i64: 4, 1>}, {pipeline_mode = #tpu.pipeline_mode<synchronous>, transform_indices = @transform_2, window_bounds = array<i64: 1, 256>}, {transform_indices = @transform_3, window_bounds = array<i64: 1, 4, 256>}, {transform_indices = @transform_4, window_bounds = array<i64: 1, 4, 256>}, {transform_indices = @transform_5, window_bounds = array<i64: 1, 8, 128>}]} {
    %c0 = arith.constant 0 : index
    %c0_0 = arith.constant 0 : index
    %c0_1 = arith.constant 0 : index
    %0 = vector.load %arg4[%c0, %c0_0, %c0_1] : memref<1x4x256xbf16, #tpu.memory_space<vmem>>, vector<1x4x256xbf16>
    %1 = vector.shape_cast %0 : vector<1x4x256xbf16> to vector<4x256xbf16>
    %2 = arith.extf %1 : vector<4x256xbf16> to vector<4x256xf32>
    %cst = arith.constant 0.000000e+00 : f32
    %3 = vector.broadcast %cst : f32 to vector<4x222xf32>
    %c0_2 = arith.constant 0 : index
    %c0_3 = arith.constant 0 : index
    %c0_4 = arith.constant 0 : index
    %4 = vector.load %arg1[%c0_2, %c0_3, %c0_4] : memref<9x4x4xf32, #tpu.memory_space<vmem>>, vector<1x4x4xf32>
    %5 = vector.shape_cast %4 : vector<1x4x4xf32> to vector<4x4xf32>
    %6 = vector.extract_strided_slice %2 {offsets = [0, 0], sizes = [4, 222], strides = [1, 1]} : vector<4x256xf32> to vector<4x222xf32>
    %cst_5 = arith.constant dense<0.000000e+00> : vector<4x222xf32>
    %7 = tpu.matmul %5, %6, %cst_5 {dimension_numbers = #tpu.dot_dimension_numbers<[1], [0], [0], [1], [0, 0, 1, 1], [], []>} : vector<4x4xf32>, vector<4x222xf32>, vector<4x222xf32> -> vector<4x222xf32>
    %8 = arith.addf %3, %7 : vector<4x222xf32>
    %c1 = arith.constant 1 : index
    %c0_6 = arith.constant 0 : index
    %c0_7 = arith.constant 0 : index
    %9 = vector.load %arg1[%c1, %c0_6, %c0_7] : memref<9x4x4xf32, #tpu.memory_space<vmem>>, vector<1x4x4xf32>
    %10 = vector.shape_cast %9 : vector<1x4x4xf32> to vector<4x4xf32>
    %11 = vector.extract_strided_slice %2 {offsets = [0, 1], sizes = [4, 222], strides = [1, 1]} : vector<4x256xf32> to vector<4x222xf32>
    %cst_8 = arith.constant dense<0.000000e+00> : vector<4x222xf32>
    %12 = tpu.matmul %10, %11, %cst_8 {dimension_numbers = #tpu.dot_dimension_numbers<[1], [0], [0], [1], [0, 0, 1, 1], [], []>} : vector<4x4xf32>, vector<4x222xf32>, vector<4x222xf32> -> vector<4x222xf32>
    %13 = arith.addf %8, %12 : vector<4x222xf32>
    %c2 = arith.constant 2 : index
    %c0_9 = arith.constant 0 : index
    %c0_10 = arith.constant 0 : index
    %14 = vector.load %arg1[%c2, %c0_9, %c0_10] : memref<9x4x4xf32, #tpu.memory_space<vmem>>, vector<1x4x4xf32>
    %15 = vector.shape_cast %14 : vector<1x4x4xf32> to vector<4x4xf32>
    %16 = vector.extract_strided_slice %2 {offsets = [0, 2], sizes = [4, 222], strides = [1, 1]} : vector<4x256xf32> to vector<4x222xf32>
    %cst_11 = arith.constant dense<0.000000e+00> : vector<4x222xf32>
    %17 = tpu.matmul %15, %16, %cst_11 {dimension_numbers = #tpu.dot_dimension_numbers<[1], [0], [0], [1], [0, 0, 1, 1], [], []>} : vector<4x4xf32>, vector<4x222xf32>, vector<4x222xf32> -> vector<4x222xf32>
    %18 = arith.addf %13, %17 : vector<4x222xf32>
    %c3 = arith.constant 3 : index
    %c0_12 = arith.constant 0 : index
    %c0_13 = arith.constant 0 : index
    %19 = vector.load %arg1[%c3, %c0_12, %c0_13] : memref<9x4x4xf32, #tpu.memory_space<vmem>>, vector<1x4x4xf32>
    %20 = vector.shape_cast %19 : vector<1x4x4xf32> to vector<4x4xf32>
    %21 = vector.extract_strided_slice %2 {offsets = [0, 16], sizes = [4, 222], strides = [1, 1]} : vector<4x256xf32> to vector<4x222xf32>
    %cst_14 = arith.constant dense<0.000000e+00> : vector<4x222xf32>
    %22 = tpu.matmul %20, %21, %cst_14 {dimension_numbers = #tpu.dot_dimension_numbers<[1], [0], [0], [1], [0, 0, 1, 1], [], []>} : vector<4x4xf32>, vector<4x222xf32>, vector<4x222xf32> -> vector<4x222xf32>
    %23 = arith.addf %18, %22 : vector<4x222xf32>
    %c4 = arith.constant 4 : index
    %c0_15 = arith.constant 0 : index
    %c0_16 = arith.constant 0 : index
    %24 = vector.load %arg1[%c4, %c0_15, %c0_16] : memref<9x4x4xf32, #tpu.memory_space<vmem>>, vector<1x4x4xf32>
    %25 = vector.shape_cast %24 : vector<1x4x4xf32> to vector<4x4xf32>
    %26 = vector.extract_strided_slice %2 {offsets = [0, 17], sizes = [4, 222], strides = [1, 1]} : vector<4x256xf32> to vector<4x222xf32>
    %cst_17 = arith.constant dense<0.000000e+00> : vector<4x222xf32>
    %27 = tpu.matmul %25, %26, %cst_17 {dimension_numbers = #tpu.dot_dimension_numbers<[1], [0], [0], [1], [0, 0, 1, 1], [], []>} : vector<4x4xf32>, vector<4x222xf32>, vector<4x222xf32> -> vector<4x222xf32>
    %28 = arith.addf %23, %27 : vector<4x222xf32>
    %c5 = arith.constant 5 : index
    %c0_18 = arith.constant 0 : index
    %c0_19 = arith.constant 0 : index
    %29 = vector.load %arg1[%c5, %c0_18, %c0_19] : memref<9x4x4xf32, #tpu.memory_space<vmem>>, vector<1x4x4xf32>
    %30 = vector.shape_cast %29 : vector<1x4x4xf32> to vector<4x4xf32>
    %31 = vector.extract_strided_slice %2 {offsets = [0, 18], sizes = [4, 222], strides = [1, 1]} : vector<4x256xf32> to vector<4x222xf32>
    %cst_20 = arith.constant dense<0.000000e+00> : vector<4x222xf32>
    %32 = tpu.matmul %30, %31, %cst_20 {dimension_numbers = #tpu.dot_dimension_numbers<[1], [0], [0], [1], [0, 0, 1, 1], [], []>} : vector<4x4xf32>, vector<4x222xf32>, vector<4x222xf32> -> vector<4x222xf32>
    %33 = arith.addf %28, %32 : vector<4x222xf32>
    %c6 = arith.constant 6 : index
    %c0_21 = arith.constant 0 : index
    %c0_22 = arith.constant 0 : index
    %34 = vector.load %arg1[%c6, %c0_21, %c0_22] : memref<9x4x4xf32, #tpu.memory_space<vmem>>, vector<1x4x4xf32>
    %35 = vector.shape_cast %34 : vector<1x4x4xf32> to vector<4x4xf32>
    %36 = vector.extract_strided_slice %2 {offsets = [0, 32], sizes = [4, 222], strides = [1, 1]} : vector<4x256xf32> to vector<4x222xf32>
    %cst_23 = arith.constant dense<0.000000e+00> : vector<4x222xf32>
    %37 = tpu.matmul %35, %36, %cst_23 {dimension_numbers = #tpu.dot_dimension_numbers<[1], [0], [0], [1], [0, 0, 1, 1], [], []>} : vector<4x4xf32>, vector<4x222xf32>, vector<4x222xf32> -> vector<4x222xf32>
    %38 = arith.addf %33, %37 : vector<4x222xf32>
    %c7 = arith.constant 7 : index
    %c0_24 = arith.constant 0 : index
    %c0_25 = arith.constant 0 : index
    %39 = vector.load %arg1[%c7, %c0_24, %c0_25] : memref<9x4x4xf32, #tpu.memory_space<vmem>>, vector<1x4x4xf32>
    %40 = vector.shape_cast %39 : vector<1x4x4xf32> to vector<4x4xf32>
    %41 = vector.extract_strided_slice %2 {offsets = [0, 33], sizes = [4, 222], strides = [1, 1]} : vector<4x256xf32> to vector<4x222xf32>
    %cst_26 = arith.constant dense<0.000000e+00> : vector<4x222xf32>
    %42 = tpu.matmul %40, %41, %cst_26 {dimension_numbers = #tpu.dot_dimension_numbers<[1], [0], [0], [1], [0, 0, 1, 1], [], []>} : vector<4x4xf32>, vector<4x222xf32>, vector<4x222xf32> -> vector<4x222xf32>
    %43 = arith.addf %38, %42 : vector<4x222xf32>
    %c8 = arith.constant 8 : index
    %c0_27 = arith.constant 0 : index
    %c0_28 = arith.constant 0 : index
    %44 = vector.load %arg1[%c8, %c0_27, %c0_28] : memref<9x4x4xf32, #tpu.memory_space<vmem>>, vector<1x4x4xf32>
    %45 = vector.shape_cast %44 : vector<1x4x4xf32> to vector<4x4xf32>
    %46 = vector.extract_strided_slice %2 {offsets = [0, 34], sizes = [4, 222], strides = [1, 1]} : vector<4x256xf32> to vector<4x222xf32>
    %cst_29 = arith.constant dense<0.000000e+00> : vector<4x222xf32>
    %47 = tpu.matmul %45, %46, %cst_29 {dimension_numbers = #tpu.dot_dimension_numbers<[1], [0], [0], [1], [0, 0, 1, 1], [], []>} : vector<4x4xf32>, vector<4x222xf32>, vector<4x222xf32> -> vector<4x222xf32>
    %48 = arith.addf %43, %47 : vector<4x222xf32>
    %c0_30 = arith.constant 0 : index
    %c0_31 = arith.constant 0 : index
    %49 = vector.load %arg2[%c0_30, %c0_31] : memref<4x1xf32, #tpu.memory_space<vmem>>, vector<4x1xf32>
    %50 = vector.broadcast %49 : vector<4x1xf32> to vector<4x222xf32>
    %51 = arith.addf %48, %50 : vector<4x222xf32>
    %cst_32 = arith.constant 0.000000e+00 : f32
    %52 = vector.broadcast %cst_32 : f32 to vector<4x222xf32>
    %53 = arith.maximumf %51, %52 : vector<4x222xf32>
    %54 = arith.truncf %53 : vector<4x222xf32> to vector<4x222xbf16>
    %c0_33 = arith.constant 0 : index
    %c0_34 = arith.constant 0 : index
    %c0_35 = arith.constant 0 : index
    %55 = vector.load %arg5[%c0_33, %c0_34, %c0_35] : memref<1x4x256xbf16, #tpu.memory_space<vmem>>, vector<1x4x222xbf16>
    %56 = vector.shape_cast %55 : vector<1x4x222xbf16> to vector<4x222xbf16>
    %57 = vector.shape_cast %54 : vector<4x222xbf16> to vector<1x4x222xbf16>
    tpu.vector_store %arg5[%c0_33, %c0_34, %c0_35], %57 {strides = array<i32>} : memref<1x4x256xbf16, #tpu.memory_space<vmem>>, vector<1x4x222xbf16>,
    %cst_36 = arith.constant 0.000000e+00 : bf16
    %58 = vector.broadcast %cst_36 : bf16 to vector<4x34xbf16>
    %c0_37 = arith.constant 0 : index
    %c0_38 = arith.constant 0 : index
    %c222 = arith.constant 222 : index
    %59 = vector.load %arg5[%c0_37, %c0_38, %c222] : memref<1x4x256xbf16, #tpu.memory_space<vmem>>, vector<1x4x34xbf16>
    %60 = vector.shape_cast %59 : vector<1x4x34xbf16> to vector<4x34xbf16>
    %61 = vector.shape_cast %58 : vector<4x34xbf16> to vector<1x4x34xbf16>
    tpu.vector_store %arg5[%c0_37, %c0_38, %c222], %61 {strides = array<i32>} : memref<1x4x256xbf16, #tpu.memory_space<vmem>>, vector<1x4x34xbf16>,
    %c0_39 = arith.constant 0 : index
    %c0_40 = arith.constant 0 : index
    %62 = vector.load %arg3[%c0_39, %c0_40] : memref<1x256xf32, #tpu.memory_space<vmem>>, vector<1x256xf32>
    %63 = vector.extract_strided_slice %62 {offsets = [0, 0], sizes = [1, 222], strides = [1, 1]} : vector<1x256xf32> to vector<1x222xf32>
    %cst_41 = arith.constant 0.000000e+00 : f32
    %64 = vector.broadcast %cst_41 : f32 to vector<1x222xf32>
    %65 = arith.cmpf ogt, %63, %64 : vector<1x222xf32>
    %cst_42 = arith.constant 0.000000e+00 : f32
    %66 = vector.shape_cast %65 : vector<1x222xi1> to vector<1x222xi1>
    %67 = vector.broadcast %66 : vector<1x222xi1> to vector<4x222xi1>
    %68 = vector.broadcast %cst_42 : f32 to vector<4x222xf32>
    %69 = arith.select %67, %53, %68 : vector<4x222xi1>, vector<4x222xf32>
    %cst_43 = arith.constant dense<0.000000e+00> : vector<4xf32>
    %70 = vector.multi_reduction <add>, %69, %cst_43 [1] : vector<4x222xf32> to vector<4xf32>
    %71 = vector.shape_cast %70 : vector<4xf32> to vector<4x1xf32>
    %72 = arith.mulf %69, %69 : vector<4x222xf32>
    %cst_44 = arith.constant dense<0.000000e+00> : vector<4xf32>
    %73 = vector.multi_reduction <add>, %72, %cst_44 [1] : vector<4x222xf32> to vector<4xf32>
    %74 = vector.shape_cast %73 : vector<4xf32> to vector<4x1xf32>
    %75 = tpu.concatenate %71, %74 in 0 : vector<4x1xf32>, vector<4x1xf32> -> vector<8x1xf32>
    %76 = vector.shape_cast %75 : vector<8x1xf32> to vector<8x1xf32>
    %77 = vector.broadcast %76 : vector<8x1xf32> to vector<8x128xf32>
    %c0_45 = arith.constant 0 : index
    %c0_46 = arith.constant 0 : index
    %c0_47 = arith.constant 0 : index
    %78 = vector.load %arg6[%c0_45, %c0_46, %c0_47] : memref<1x8x128xf32, #tpu.memory_space<vmem>>, vector<1x8x128xf32>
    %79 = vector.shape_cast %78 : vector<1x8x128xf32> to vector<8x128xf32>
    %80 = vector.shape_cast %77 : vector<8x128xf32> to vector<1x8x128xf32>
    tpu.vector_store %arg6[%c0_45, %c0_46, %c0_47], %80 {strides = array<i32>} : memref<1x8x128xf32, #tpu.memory_space<vmem>>, vector<1x8x128xf32>,
    return
  }
  func.func @transform_0(%arg0: i32) -> (i32, i32, i32) {
    %c0_i32 = arith.constant 0 : i32
    %c0_i32_0 = arith.constant 0 : i32
    %c0_i32_1 = arith.constant 0 : i32
    %c0_i32_2 = arith.constant 0 : i32
    return %c0_i32, %c0_i32_0, %c0_i32_1 : i32, i32, i32
  }
  func.func @transform_1(%arg0: i32) -> (i32, i32) {
    %c0_i32 = arith.constant 0 : i32
    %c0_i32_0 = arith.constant 0 : i32
    %c0_i32_1 = arith.constant 0 : i32
    return %c0_i32, %c0_i32_0 : i32, i32
  }
  func.func @transform_2(%arg0: i32) -> (i32, i32) {
    %c0_i32 = arith.constant 0 : i32
    %c0_i32_0 = arith.constant 0 : i32
    %c0_i32_1 = arith.constant 0 : i32
    return %c0_i32, %c0_i32_0 : i32, i32
  }
  func.func @transform_3(%arg0: i32) -> (i32, i32, i32) {
    %c0_i32 = arith.constant 0 : i32
    %c0_i32_0 = arith.constant 0 : i32
    %c0_i32_1 = arith.constant 0 : i32
    return %arg0, %c0_i32, %c0_i32_0 : i32, i32, i32
  }
  func.func @transform_4(%arg0: i32) -> (i32, i32, i32) {
    %c0_i32 = arith.constant 0 : i32
    %c0_i32_0 = arith.constant 0 : i32
    %c0_i32_1 = arith.constant 0 : i32
    return %arg0, %c0_i32, %c0_i32_0 : i32, i32, i32
  }
  func.func @transform_5(%arg0: i32) -> (i32, i32, i32) {
    %c0_i32 = arith.constant 0 : i32
    %c0_i32_0 = arith.constant 0 : i32
    %c0_i32_1 = arith.constant 0 : i32
    return %arg0, %c0_i32, %c0_i32_0 : i32, i32, i32
  }
}

</mosaic_0001>

<bundles_post_ra>
// kernel: tile.8
= control target key start
LH: loop header
LB: loop body
LE: loop exit
PB: predicated region body
PF: predicated region fallthrough
CT: control target
= control target key end

     0   :  { %s22_s0 = inlined_call_operand.vmem [shape: f32[4], index: 0, kind: input, shape index: {}]   ;;  %s23_s1 = inlined_call_operand.vmem [shape: f32[4,4], index: 1, kind: output, shape index: {}]  }
   0x1   :  { %v4_v0 = vld [vmem:[%s22_s0] ss:$0 sm:$0xff] }
   0x2   :  { %5 = vst [vmem:[%s23_s1] sm:$0xf] %v4_v0 }

// kernel: tile.0
= control target key start
LH: loop header
LB: loop body
LE: loop exit
PB: predicated region body
PF: predicated region fallthrough
CT: control target
= control target key end

     0   :  { %s35_s8 = smov 125   ;;  %vm8_vm0 = vcmask 7168   ;;  %s36_s11 = smov 126   ;;  %s62_s0 = inlined_call_operand.vmem [shape: f32[4,4], index: 0, kind: input, shape index: {}]   ;;  %s63_s1 = inlined_call_operand.vmem [shape: f32[16,1], index: 1, kind: output, shape index: {}]  }
   0x1   :  { %v5_v0 = vld [vmem:[%s62_s0] sm:$0xf]  ;;  %s34_s0 = smov 127  }
   0x2   :  { %6 = vst [vmem:[#allocation0] sm:$0xf] %v5_v0 }
   0x9   :  { %v10_v1 = vld [vmem:[#allocation0] sm:$0xf]  }
   0xa   :  { %v22_v2 = vld [vmem:[#allocation0] sm:$0xf]   ;;  %11 = vrot.lane.b32.xlu0 %v10_v1, %s34_s0 }
   0xb   :  { %23 = vrot.lane.b32.xlu1 %v22_v2, %s35_s8  ;;  %v7_v3 = vld [vmem:[#allocation0] sm:$0xf]  }
   0xc   :  { %v16_v4 = vld [vmem:[#allocation0] sm:$0xf]   ;;  %9 = vst.msk [vmem:[%s63_s1] ss:$4 sm:$0xf] %vm8_vm0, %v7_v3  }
   0xe   :  { %17 = vrot.lane.b32.xlu0 %v16_v4, %s36_s11 }
  0x7c   :  { %v12_v5 = vpop.permute.xlu0 %11  }
  0x7d   :  { %v24_v6 = vpop.permute.xlu1 %23   ;;  %28 = vst.msk [vmem:[%s63_s1 + $0x1] ss:$4 sm:$0xf] %vm8_vm0, %v12_v5  }
  0x7e   :  { %30 = vst.msk [vmem:[%s63_s1 + $0x3] ss:$4 sm:$0xf] %vm8_vm0, %v24_v6  }
  0x80   :  { %v18_v7 = vpop.permute.xlu0 %17  }
  0x81   :  { %29 = vst.msk [vmem:[%s63_s1 + $0x2] ss:$4 sm:$0xf] %vm8_vm0, %v18_v7  }

// kernel: upstep_forward.3
= control target key start
LH: loop header
LB: loop body
LE: loop exit
PB: predicated region body
PF: predicated region fallthrough
CT: control target
= control target key end

     0   :  { %s395_s12 = smov 0   ;;  %s424_s0 = inlined_call_operand.vmem [shape: f32[16,8], index: 0, kind: input, shape index: {}]   ;;  %s425_s1 = inlined_call_operand.vmem [shape: f32[16,1], index: 1, kind: input, shape index: {}]   ;;  %s426_s2 = inlined_call_operand.vmem [shape: f32[2,8,64], index: 2, kind: input, shape index: {}]   ;;  %s427_s3 = inlined_call_operand.vmem [shape: bf16[2,16,64], index: 3, kind: output, shape index: {}]  }
   0x1 LB: > { %s331_s13 = sadd.s32 4294967295, %s372_s12   ;;  %p335_p0 = scmp.ge.s32.totalorder %s372_s12, 1  ;;  %s372_s12 = sphi %s395_s12, %s13_s12  }
   0x2   : > { %p136_p1 = scmp.lt.s32.totalorder %s372_s12, 3 }
   0x4   : > { %p137_p2 = pnand %p335_p0, %p136_p1 }
   0x5   : > { %p159_p3 = scmp.lt.s32.totalorder (!%p137_p2), %s331_s13, 1 }
   0x6   : > { %140 = sbr.rel (%p137_p2) target bundleno = 217 (0xd9), region = 32 }
   0xb   : > { %v168_v0 = vld [vmem:[%s424_s0] sm:$0xff]  ;;  %vm183_vm0 = vcmask 64512   ;;  %v374_v2 = vmov 0   ;;  %s429_s13 = smov (!%p159_p3, %s331_s13), 1  ;;  %v172_v3 = vld [vmem:[%s425_s1 + $0x8] sm:$0xff]  ;;  %vm273_vm1 = vcmask 519168  }
   0xc   : > { %v171_v1 = vld [vmem:[%s425_s1] sm:$0xff]  ;;  %353 = vmatprep.mubr.msk.f32.mxu0 %vm183_vm0, %v168_v0  ;;  %365 = vset.pattern.permute.xlu0 %v374_v2  ;;  %s336_s20 = sshll.u32 %s429_s13, 3  ;;  %v169_v5 = vld [vmem:[%s424_s0 + $0x8] sm:$0xff] }
   0xd   : > { %175 = vperm.xlu0 %365, %v171_v1   ;;  %s162_s23 = scalar_lea.vmem %s426_s2, %s336_s20  ;;  %s167_s28 = scalar_lea.vmem %s427_s3, %s336_s20 }
   0xe   : > { %v170_v4 = vld [vmem:[%s162_s23] sm:$0xff] }
   0xf   : > { %351 = vmatprep.subr.mxu0 %v170_v4 }
  0x10   : > { %352 = vmatpush3.msra.mxu0 %v170_v4 }
  0x11   : > { %180 = vperm.xlu0 %365, %v172_v3   ;;  %354 = vmatmul.mubr.msk.f32.vlgmr.msra.gmra.mxu0 %vm183_vm0, %v169_v5 }
  0x88   : > { %v176_v6 = vpop.permute.xlu0 %175 }
  0x8c   : > { %v181_v7 = vpop.permute.xlu0 %180 }
  0xd1   : > { %v355_v8 = vpop.f32.mrf.mxu0 }
  0xd2   : > { %v262_v9 = vadd.f32 %v355_v8, %v181_v7 }
  0xd3   : > { %v256_v10 = vpop.f32.mrf.mxu0 }
  0xd4   : > { %v347_v11 = vpack.c.bf16 %v262_v9, %v262_v9  ;;  %v257_v12 = vadd.f32 %v256_v10, %v176_v6 }
  0xd6   : > { %275 = vst.msk [vmem:[%s167_s28 + $0x4] sm:$0xf] %vm273_vm1, %v347_v11  ;;  %v346_v13 = vpack.c.bf16 %v257_v12, %v257_v12 }
  0xd8   : > { %274 = vst.msk [vmem:[%s167_s28] sm:$0xf] %vm273_vm1, %v346_v13 }
  0xd9 PF: > { %s13_s12 = sadd.s32 1, %s372_s12  }
  0xda   : > { %p10_p4 = scmp.ge.s32.totalorder %s13_s12, 4  }
  0xdc   :  { %12 = sbr.rel (!%p10_p4) target bundleno = 1 (0x1), region = 62 }

// kernel: upstep_forward.4
= control target key start
LH: loop header
LB: loop body
LE: loop exit
PB: predicated region body
PF: predicated region fallthrough
CT: control target
= control target key end

     0   :  { %s1300_s18 = smov 0   ;;  %s1386_s0 = inlined_call_operand.vmem [shape: f32[9,4,8], index: 0, kind: input, shape index: {}]   ;;  %s1387_s1 = inlined_call_operand.vmem [shape: f32[4,1], index: 1, kind: input, shape index: {}]   ;;  %s1388_s2 = inlined_call_operand.vmem [shape: f32[1,256], index: 2, kind: input, shape index: {}]   ;;  %s1389_s3 = inlined_call_operand.vmem [shape: bf16[2,8,256], index: 3, kind: input, shape index: {}]   ;;  %s1390_s4 = inlined_call_operand.vmem [shape: bf16[2,4,256], index: 4, kind: output, shape index: {0}]   ;;  %s1391_s5 = inlined_call_operand.vmem [shape: f32[2,8,128], index: 5, kind: output, shape index: {1}]  }
   0x1 LB: > { %s1158_s19 = sadd.s32 4294967295, %s1257_s18   ;;  %p1162_p0 = scmp.ge.s32.totalorder %s1257_s18, 1  ;;  %s1257_s18 = sphi %s1300_s18, %s16_s18  }
   0x2   : > { %p190_p1 = scmp.lt.s32.totalorder %s1257_s18, 3 }
   0x4   : > { %p191_p2 = pnand %p1162_p0, %p190_p1 }
   0x5   : > { %p222_p3 = scmp.lt.s32.totalorder (!%p191_p2), %s1158_s19, 1  ;;  %s1260_s26 = smov (!%p191_p2), 127  }
   0x6   : > { %194 = sbr.rel (%p191_p2) target bundleno = 627 (0x273), region = 36  ;;  %s1261_s27 = smov (!%p191_p2), 112  }
   0x7   : > { %s1262_s28 = smov (!%p191_p2), 126   ;;  %s1263_s29 = smov (!%p191_p2), 111  }
   0x8   : > { %s1264_s30 = smov (!%p191_p2), 110   ;;  %s1265_s6 = smov (!%p191_p2), 96  }
   0x9   : > { %s1267_s7 = smov (!%p191_p2), 95   ;;  %s1268_s8 = smov (!%p191_p2), 94  }
   0xb   : > { %v1259_v0 = vmov 0.0   ;;  %s1393_s19 = smov (!%p222_p3, %s1158_s19), 1  ;;  %vm253_vm0 = vcmask 64512   ;;  %v240_v5 = vld [vmem:[%s1386_s0] sm:$0xf]  ;;  %v1266_v6 = vmov 0   ;;  %v1022_v56 = vlaneseq }
   0xc   : > { %321 = vmatprep.mubr.f32.mxu0 %v1259_v0  ;;  %395 = vmatprep.mubr.f32.mxu1 %v1259_v0  ;;  %s1188_s20 = sshll.u32 %s1393_s19, 3  ;;  %v1004_v7 = vld [vmem:[%s1387_s1] sm:$0xf]  ;;  %vm249_vm1 = vcmask 1039360   ;;  %vm494_vm2 = vcmask 916480   ;;  %vm408_vm3 = vcmask 1031168  }
   0xd   : > { %s226_s23 = scalar_lea.vmem %s1389_s3, %s1188_s20  ;;  %1249 = vset.pattern.permute.xlu0 %v1266_v6  ;;  %1250 = vset.pattern.permute.xlu1 %v1266_v6  ;;  %v1168_v14 = vld [vmem:[%s1386_s0 + $0x4] sm:$0xf]  ;;  %v1173_v15 = vld [vmem:[%s1386_s0 + $0xc] sm:$0xf]  ;;  %vm580_vm4 = vcmask 908288   ;;  %vm666_vm5 = vcmask 900096   ;;  %s235_s13 = scalar_lea.vmem %s1391_s5, %s1188_s20 }
   0xe   : > { %v237_v1 = vld [vmem:[%s226_s23] sm:$0xff]  ;;  %v1171_v24 = vld [vmem:[%s1386_s0 + $0x8] sm:$0xf]  ;;  %vm752_vm6 = vcmask 785408   ;;  %v1175_v33 = vld [vmem:[%s1386_s0 + $0x10] sm:$0xf] }
   0xf   : > { %v238_v2 = vunpack.c.l.bf16 %v237_v1  ;;  %v239_v3 = vunpack.c.h.bf16 %v237_v1  ;;  %v1177_v34 = vld [vmem:[%s1386_s0 + $0x14] sm:$0xf]  ;;  %vm838_vm7 = vcmask 777216   ;;  %vm924_vm8 = vcmask 769024   ;;  %v1179_v43 = vld [vmem:[%s1386_s0 + $0x18] sm:$0xf] }
  0x10   : > { %v1181_v44 = vld [vmem:[%s1386_s0 + $0x1c] sm:$0xf]  ;;  %v1183_v47 = vld [vmem:[%s1386_s0 + $0x20] sm:$0xf]  ;;  %v1023_v1 = vshrl.u32 %v1022_v56, 7  ;;  %vm1027_vm11 = vcmask 1041408  }
  0x11   : > { %v1209_v4 = vpack.i.bf16 %v239_v3, %v238_v2  ;;  %361 = vmatprep.subr.mxu1 %v239_v3  ;;  %v1033_v62 = vld [vmem:[%s1388_s2] sm:$0x3]  ;;  %vm1028_vm12 = vcmask 764930   ;;  %vm1048_vm14 = vcmask 1043456   ;;  %vm1050_vm15 = vcmask 764928  }
  0x12   : > { %362 = vmatpush1.msra.mxu1 %v238_v2  ;;  %vm1034_vm9 = vcmp.gt.f32.partialorder %v1033_v62, 0.0 }
  0x13   : > { %1210 = vrot.lane.b32.xlu0 %v1209_v4, %s1260_s26  ;;  %1220 = vrot.lane.b32.xlu1 %v1209_v4, %s1261_s27 }
  0x14   : > { %1170 = vmatmul.mubr.msk.f32.vlgmr.msra.gmra.mxu1 %vm253_vm0, %v240_v5 }
  0x15   : > { %565 = vmatprep.mubr.f32.mxu1 %v1259_v0 }
  0x17   : > { %1215 = vrot.lane.b32.xlu0 %v1209_v4, %s1262_s28  ;;  %1225 = vrot.lane.b32.xlu1 %v1209_v4, %s1263_s29 }
  0x1b   : > { %1230 = vrot.lane.b32.xlu0 %v1209_v4, %s1264_s30  ;;  %1235 = vrot.lane.b32.xlu1 %v1209_v4, %s1265_s6 }
  0x1f   : > { %1240 = vrot.lane.b32.xlu0 %v1209_v4, %s1267_s7  ;;  %1245 = vrot.lane.b32.xlu1 %v1209_v4, %s1268_s8  ;;  %s1189_s7 = sshll.u32 %s1393_s19, 2 }
  0x20   : > { %s231_s10 = scalar_lea.vmem %s1390_s4, %s1189_s7 }
  0x23   : > { %1007 = vperm.xlu0 %1249, %v1004_v7  }
  0x85   : > { %v1211_v8 = vpop.permute.xlu0 %1210  ;;  %v1221_v9 = vpop.permute.xlu1 %1220 }
  0x86   : > { %v1212_v10 = vunpack.i.l.bf16 %v1211_v8  ;;  %v1213_v11 = vunpack.i.h.bf16 %v1211_v8  ;;  %v1223_v12 = vunpack.i.h.bf16 %v1221_v9  ;;  %v1222_v13 = vunpack.i.l.bf16 %v1221_v9 }
  0x88   : > { %287 = vmatprep.subr.mxu0 %v1213_v11  ;;  %v250_v16 = vsel %vm249_vm1, %v1212_v10, %v1213_v11  ;;  %531 = vmatprep.subr.mxu1 %v1223_v12  ;;  %v495_v17 = vsel %vm494_vm2, %v1222_v13, %v1223_v12  ;;  %v1038_v11 = vsub.s32 0, %v1023_v1  ;;  %vm1031_vm1 = vcmask 1042160  }
  0x89   : > { %v1216_v18 = vpop.permute.xlu0 %1215  ;;  %288 = vmatpush1.msra.mxu0 %v250_v16  ;;  %v1226_v19 = vpop.permute.xlu1 %1225  ;;  %532 = vmatpush1.msra.mxu1 %v495_v17  ;;  %v1042_v16 = vsub.s32 1, %v1023_v1 }
  0x8a   : > { %v1218_v20 = vunpack.i.h.bf16 %v1216_v18  ;;  %v1217_v21 = vunpack.i.l.bf16 %v1216_v18  ;;  %1169 = vmatmul.mubr.msk.f32.vlgmr.msra.gmra.mxu0 %vm253_vm0, %v1168_v14  ;;  %v1228_v22 = vunpack.i.h.bf16 %v1226_v19  ;;  %v1227_v23 = vunpack.i.l.bf16 %v1226_v19  ;;  %1174 = vmatmul.mubr.msk.f32.vlgmr.msra.gmra.mxu1 %vm253_vm0, %v1173_v15 }
  0x8b   : > { %479 = vmatprep.mubr.f32.mxu0 %v1259_v0  ;;  %737 = vmatprep.mubr.f32.mxu1 %v1259_v0  ;;  %v1035_v14 = vsel %vm1034_vm9, 1, %v1266_v6  ;;  %v1269_v19 = vmov 1983009808  }
  0x8c   : > { %445 = vmatprep.subr.mxu0 %v1218_v20  ;;  %v409_v25 = vsel %vm408_vm3, %v1217_v21, %v1218_v20  ;;  %v581_v26 = vsel %vm580_vm4, %v1227_v23, %v1228_v22  ;;  %v1020_v20 = vunpack.c.l.s4 %v1269_v19 }
  0x8d   : > { %446 = vmatpush1.msra.mxu0 %v409_v25  ;;  %v1231_v27 = vpop.permute.xlu0 %1230  ;;  %v1236_v28 = vpop.permute.xlu1 %1235 }
  0x8e   : > { %1172 = vmatmul.mubr.msk.f32.vlgmr.msra.gmra.mxu0 %vm253_vm0, %v1171_v24  ;;  %v1233_v29 = vunpack.i.h.bf16 %v1231_v27  ;;  %v1232_v30 = vunpack.i.l.bf16 %v1231_v27  ;;  %617 = vmatprep.subr.mxu0 %v1228_v22  ;;  %v1238_v31 = vunpack.i.h.bf16 %v1236_v28  ;;  %v1237_v32 = vunpack.i.l.bf16 %v1236_v28 }
  0x8f   : > { %618 = vmatpush1.msra.mxu0 %v581_v26  ;;  %651 = vmatprep.mubr.f32.mxu0 %v1259_v0  ;;  %v1039_v24 = vrot.slane %v1035_v14, %v1038_v11  ;;  %v1043_v28 = vrot.slane %v1035_v14, %v1042_v16 }
  0x90   : > { %703 = vmatprep.subr.mxu1 %v1233_v29  ;;  %v667_v35 = vsel %vm666_vm5, %v1232_v30, %v1233_v29  ;;  %789 = vmatprep.subr.mxu0 %v1238_v31  ;;  %v753_v36 = vsel %vm752_vm6, %v1237_v32, %v1238_v31  ;;  %v1021_v30 = vunpack.c.0.s8 %v1020_v20 }
  0x91   : > { %v1241_v37 = vpop.permute.xlu0 %1240  ;;  %704 = vmatpush1.msra.mxu1 %v667_v35  ;;  %v1246_v38 = vpop.permute.xlu1 %1245  ;;  %vm1044_vm10 = vcmp.eq.s32.totalorder %v1039_v24, 1  ;;  %vm1045_vm13 = vcmp.eq.s32.totalorder %v1043_v28, 1 }
  0x92   : > { %1176 = vmatmul.mubr.msk.f32.vlgmr.msra.gmra.mxu0 %vm253_vm0, %v1175_v33  ;;  %v1243_v39 = vunpack.i.h.bf16 %v1241_v37  ;;  %v1242_v40 = vunpack.i.l.bf16 %v1241_v37  ;;  %1178 = vmatmul.mubr.msk.f32.vlgmr.msra.gmra.mxu1 %vm253_vm0, %v1177_v34  ;;  %v1248_v41 = vunpack.i.h.bf16 %v1246_v38  ;;  %v1247_v42 = vunpack.i.l.bf16 %v1246_v38 }
  0x93   : > { %790 = vmatpush1.msra.mxu0 %v753_v36  ;;  %823 = vmatprep.mubr.f32.mxu0 %v1259_v0  ;;  %v1024_v34 = vsub.s32 %v1021_v30, %v1023_v1 }
  0x94   : > { %875 = vmatprep.subr.mxu1 %v1243_v39  ;;  %v839_v45 = vsel %vm838_vm7, %v1242_v40, %v1243_v39  ;;  %909 = vmatprep.mubr.f32.mxu1 %v1259_v0  ;;  %v925_v46 = vsel %vm924_vm8, %v1247_v42, %v1248_v41 }
  0x95   : > { %876 = vmatpush1.msra.mxu1 %v839_v45  ;;  %961 = vmatprep.subr.mxu0 %v1248_v41 }
  0x96   : > { %1180 = vmatmul.mubr.msk.f32.vlgmr.msra.gmra.mxu0 %vm253_vm0, %v1179_v43  ;;  %1182 = vmatmul.mubr.msk.f32.vlgmr.msra.gmra.mxu1 %vm253_vm0, %v1181_v44 }
  0x97   : > { %962 = vmatpush1.msra.mxu0 %v925_v46  ;;  %995 = vmatprep.mubr.f32.mxu0 %v1259_v0 }
  0x9a   : > { %1184 = vmatmul.mubr.msk.f32.vlgmr.msra.gmra.mxu0 %vm253_vm0, %v1183_v47  ;;  %vm1029_vm0 = vmor %vm1028_vm12, %vm1027_vm11 }
  0x9e   : > { %v1008_v21 = vpop.permute.xlu0 %1007 }
  0xd4   : > { %v397_v48 = vpop.f32.mrf.mxu1 }
  0xd6   : > { %v399_v49 = vpop.f32.mrf.mxu1 }
 0x14a   : > { %v323_v50 = vpop.f32.mrf.mxu0  ;;  %v567_v51 = vpop.f32.mrf.mxu1 }
 0x14b   : > { %v398_v53 = vadd.f32 %v397_v48, %v323_v50 }
 0x14c   : > { %v325_v52 = vpop.f32.mrf.mxu0  ;;  %v569_v55 = vpop.f32.mrf.mxu1 }
 0x14d   : > { %v400_v57 = vadd.f32 %v399_v49, %v325_v52 }
 0x14e   : > { %v481_v54 = vpop.f32.mrf.mxu0 }
 0x14f   : > { %v486_v58 = vadd.f32 %v481_v54, %v398_v53 }
 0x150   : > { %v483_v59 = vpop.f32.mrf.mxu0 }
 0x151   : > { %v487_v60 = vadd.f32 %v483_v59, %v400_v57  ;;  %v572_v61 = vadd.f32 %v567_v51, %v486_v58 }
 0x152   : > { %v653_v63 = vpop.f32.mrf.mxu0  ;;  %v739_v0 = vpop.f32.mrf.mxu1 }
 0x153   : > { %v573_v2 = vadd.f32 %v569_v55, %v487_v60  ;;  %v658_v3 = vadd.f32 %v653_v63, %v572_v61 }
 0x154   : > { %v655_v4 = vpop.f32.mrf.mxu0  ;;  %v741_v5 = vpop.f32.mrf.mxu1 }
 0x155   : > { %v659_v7 = vadd.f32 %v655_v4, %v573_v2  ;;  %v744_v8 = vadd.f32 %v739_v0, %v658_v3 }
 0x156   : > { %v825_v9 = vpop.f32.mrf.mxu0  ;;  %v911_v10 = vpop.f32.mrf.mxu1 }
 0x157   : > { %v745_v12 = vadd.f32 %v741_v5, %v659_v7  ;;  %v830_v13 = vadd.f32 %v825_v9, %v744_v8 }
 0x158   : > { %v827_v15 = vpop.f32.mrf.mxu0  ;;  %v913_v22 = vpop.f32.mrf.mxu1 }
 0x159   : > { %v831_v17 = vadd.f32 %v827_v15, %v745_v12  ;;  %v916_v18 = vadd.f32 %v911_v10, %v830_v13 }
 0x15a   : > { %v997_v23 = vpop.f32.mrf.mxu0 }
 0x15b   : > { %v917_v25 = vadd.f32 %v913_v22, %v831_v17  ;;  %v1002_v26 = vadd.f32 %v997_v23, %v916_v18 }
 0x15c   : > { %v999_v27 = vpop.f32.mrf.mxu0 }
 0x15d   : > { %v1003_v29 = vadd.f32 %v999_v27, %v917_v25  ;;  %v1010_v31 = vadd.f32 %v1008_v21, %v1002_v26 }
 0x15f   : > { %v1011_v32 = vadd.f32 %v1008_v21, %v1003_v29  ;;  %v1012_v33 = vmax.f32 %v1010_v31, 0.0 }
 0x161   : > { %v1013_v35 = vmax.f32 %v1011_v32, 0.0  ;;  %v1046_v36 = vsel %vm1044_vm10, %v1012_v33, 0.0 }
 0x162   : > { %v1055_v37 = vmul.f32 %v1046_v36, %v1046_v36  ;;  %v1049_v40 = vsel %vm1048_vm14, %v1046_v36, 0.0 }
 0x163   : > { %v1185_v38 = vpack.c.bf16 %v1013_v35, %v1012_v33  ;;  %v1047_v39 = vsel %vm1045_vm13, %v1013_v35, 0.0 }
 0x164   : > { %v1051_v41 = vsel %vm1050_vm15, %v1047_v39, 0.0  ;;  %v1056_v42 = vmul.f32 %v1047_v39, %v1047_v39  ;;  %v1057_v45 = vsel %vm1048_vm14, %v1055_v37, 0.0 }
 0x165   : > { %v1025_v43 = vrot.slane %v1185_v38, %v1024_v34  ;;  %v1052_v44 = vadd.f32 %v1051_v41, %v1049_v40 }
 0x166   : > { %v1058_v46 = vsel %vm1050_vm15, %v1056_v42, 0.0 }
 0x167   : > { %1030 = vst.msk [vmem:[%s231_s10] sm:$0xf] %vm1029_vm0, %v1025_v43  ;;  %1053 = vadd.xlane.f32.xlu0 %v1052_v44  ;;  %v1059_v47 = vadd.f32 %v1058_v46, %v1057_v45 }
 0x168   : > { %1032 = vst.msk [vmem:[%s231_s10 + $0x2] sm:$0x3] %vm1031_vm1, %v1266_v6 }
 0x169   : > { %1060 = vadd.xlane.f32.xlu1 %v1059_v47 }
 0x1f0   : > { %v1054_v50 = vpop.xlane.xlu0 %1053 }
 0x1f2   : > { %v1061_v48 = vpop.xlane.xlu1 %1060 }
 0x1f3   : > { %v1063_v49 = vrot.slane %v1061_v48, 4 }
 0x1f5   : > { %v1065_v51 = vsel %vm1048_vm14, %v1054_v50, %v1063_v49 }
 0x1f6   : > { %1068 = vperm.xlu1 %1250, %v1065_v51  }
 0x271   : > { %v1069_v52 = vpop.permute.xlu1 %1068 }
 0x272   : > { %1071 = vst [vmem:[%s235_s13] sm:$0xff] %v1069_v52 }
 0x273 PF: > { %s16_s18 = sadd.s32 1, %s1257_s18  }
 0x274   : > { %p13_p4 = scmp.ge.s32.totalorder %s16_s18, 4  }
 0x276   :  { %15 = sbr.rel (!%p13_p4) target bundleno = 1 (0x1), region = 86 }

// kernel: upstep_forward.5
= control target key start
LH: loop header
LB: loop body
LE: loop exit
PB: predicated region body
PF: predicated region fallthrough
CT: control target
= control target key end

     0   :  { %s1337_s18 = smov 0   ;;  %s1441_s0 = inlined_call_operand.vmem [shape: f32[9,4,4], index: 0, kind: input, shape index: {}]   ;;  %s1442_s1 = inlined_call_operand.vmem [shape: f32[4,1], index: 1, kind: input, shape index: {}]   ;;  %s1443_s2 = inlined_call_operand.vmem [shape: f32[1,256], index: 2, kind: input, shape index: {}]   ;;  %s1444_s3 = inlined_call_operand.vmem [shape: bf16[2,4,256], index: 3, kind: input, shape index: {}]   ;;  %s1445_s4 = inlined_call_operand.vmem [shape: bf16[2,4,256], index: 4, kind: output, shape index: {0}]   ;;  %s1446_s5 = inlined_call_operand.vmem [shape: f32[2,8,128], index: 5, kind: output, shape index: {1}]  }
   0x1 LB: > { %s1177_s19 = sadd.s32 4294967295, %s1294_s18   ;;  %p1181_p0 = scmp.ge.s32.totalorder %s1294_s18, 1  ;;  %s1294_s18 = sphi %s1337_s18, %s16_s18  }
   0x2   : > { %p190_p1 = scmp.lt.s32.totalorder %s1294_s18, 3 }
   0x4   : > { %p191_p2 = pnand %p1181_p0, %p190_p1 }
   0x5   : > { %p222_p3 = scmp.lt.s32.totalorder (!%p191_p2), %s1177_s19, 1  ;;  %s1297_s26 = smov (!%p191_p2), 127  }
   0x6   : > { %194 = sbr.rel (%p191_p2) target bundleno = 629 (0x275), region = 36  ;;  %s1298_s27 = smov (!%p191_p2), 112  }
   0x7   : > { %s1299_s28 = smov (!%p191_p2), 126   ;;  %s1300_s29 = smov (!%p191_p2), 111  }
   0x8   : > { %s1301_s30 = smov (!%p191_p2), 110   ;;  %s1302_s6 = smov (!%p191_p2), 96  }
   0x9   : > { %s1304_s7 = smov (!%p191_p2), 95   ;;  %s1305_s8 = smov (!%p191_p2), 94  }
   0xb   : > { %s1448_s19 = smov (!%p222_p3, %s1177_s19), 1  ;;  %v1296_v0 = vmov 0.0   ;;  %vm254_vm0 = vcmask 1043456   ;;  %vm250_vm1 = vcmask 31744   ;;  %v239_v5 = vld [vmem:[%s1441_s0] sm:$0xf]  ;;  %v1042_v56 = vlaneseq }
   0xc   : > { %323 = vmatprep.mubr.f32.mxu0 %v1296_v0  ;;  %401 = vmatprep.mubr.f32.mxu1 %v1296_v0  ;;  %s1225_s20 = sshll.u32 %s1448_s19, 2  ;;  %v1303_v6 = vmov 0   ;;  %v1024_v7 = vld [vmem:[%s1442_s1] sm:$0xf]  ;;  %vm248_vm2 = vcmask 1039360   ;;  %vm502_vm3 = vcmask 916480  }
   0xd   : > { %s226_s23 = scalar_lea.vmem %s1444_s3, %s1225_s20  ;;  %1286 = vset.pattern.permute.xlu0 %v1303_v6  ;;  %1287 = vset.pattern.permute.xlu1 %v1303_v6  ;;  %v1187_v14 = vld [vmem:[%s1441_s0 + $0x4] sm:$0xf]  ;;  %v1198_v15 = vld [vmem:[%s1441_s0 + $0xc] sm:$0xf]  ;;  %vm414_vm4 = vcmask 1031168   ;;  %vm590_vm5 = vcmask 908288   ;;  %s231_s9 = scalar_lea.vmem %s1445_s4, %s1225_s20 }
   0xe   : > { %v237_v1 = vld [vmem:[%s226_s23] sm:$0xf]  ;;  %v1194_v24 = vld [vmem:[%s1441_s0 + $0x8] sm:$0xf]  ;;  %vm678_vm6 = vcmask 900096   ;;  %vm766_vm7 = vcmask 785408  }
   0xf   : > { %v238_v2 = vunpack.c.l.bf16 %v237_v1  ;;  %v1202_v33 = vld [vmem:[%s1441_s0 + $0x10] sm:$0xf]  ;;  %v1206_v34 = vld [vmem:[%s1441_s0 + $0x14] sm:$0xf]  ;;  %vm854_vm8 = vcmask 777216   ;;  %vm942_vm9 = vcmask 769024  }
  0x10   : > { %v1210_v43 = vld [vmem:[%s1441_s0 + $0x18] sm:$0xf]  ;;  %v1214_v44 = vld [vmem:[%s1441_s0 + $0x1c] sm:$0xf]  ;;  %v1218_v47 = vld [vmem:[%s1441_s0 + $0x20] sm:$0xf] }
  0x11   : > { %v243_v3 = vcombine.high %v238_v2, %v238_v2  ;;  %v1053_v62 = vld [vmem:[%s1443_s2] sm:$0x3]  ;;  %v1043_v1 = vshrl.u32 %v1042_v56, 7  ;;  %vm1047_vm12 = vcmask 1041408   ;;  %vm1048_vm13 = vcmask 764930   ;;  %s1186_s20 = sshll.u32 %s1448_s19, 3 }
  0x12   : > { %vm1054_vm10 = vcmp.gt.f32.partialorder %v1053_v62, 0.0  ;;  %vm1069_vm15 = vcmask 764928   ;;  %s235_s12 = scalar_lea.vmem %s1446_s5, %s1186_s20 }
  0x13   : > { %v1246_v4 = vpack.i.bf16 %v243_v3, %v238_v2  ;;  %1191 = vmatprep.subr.msk.mxu1 %vm254_vm0, %v243_v3 }
  0x14   : > { %1192 = vmatpush1.msk.msra.mxu1 %vm254_vm0, %v238_v2 }
  0x15   : > { %1247 = vrot.lane.b32.xlu0 %v1246_v4, %s1297_s26  ;;  %1257 = vrot.lane.b32.xlu1 %v1246_v4, %s1298_s27 }
  0x16   : > { %1193 = vmatmul.mubr.msk.f32.vlgmr.msra.gmra.mxu1 %vm250_vm1, %v239_v5 }
  0x17   : > { %575 = vmatprep.mubr.f32.mxu1 %v1296_v0 }
  0x19   : > { %1252 = vrot.lane.b32.xlu0 %v1246_v4, %s1299_s28  ;;  %1262 = vrot.lane.b32.xlu1 %v1246_v4, %s1300_s29 }
  0x1d   : > { %1267 = vrot.lane.b32.xlu0 %v1246_v4, %s1301_s30  ;;  %1272 = vrot.lane.b32.xlu1 %v1246_v4, %s1302_s6 }
  0x21   : > { %1277 = vrot.lane.b32.xlu0 %v1246_v4, %s1304_s7  ;;  %1282 = vrot.lane.b32.xlu1 %v1246_v4, %s1305_s8 }
  0x25   : > { %1027 = vperm.xlu0 %1286, %v1024_v7  }
  0x87   : > { %v1248_v8 = vpop.permute.xlu0 %1247  ;;  %v1258_v9 = vpop.permute.xlu1 %1257 }
  0x88   : > { %v1249_v10 = vunpack.i.l.bf16 %v1248_v8  ;;  %v1250_v11 = vunpack.i.h.bf16 %v1248_v8  ;;  %v1260_v12 = vunpack.i.h.bf16 %v1258_v9  ;;  %v1259_v13 = vunpack.i.l.bf16 %v1258_v9 }
  0x8a   : > { %1188 = vmatprep.subr.msk.mxu0 %vm254_vm0, %v1250_v11  ;;  %v249_v16 = vsel %vm248_vm2, %v1249_v10, %v1250_v11  ;;  %1199 = vmatprep.subr.msk.mxu1 %vm254_vm0, %v1260_v12  ;;  %v503_v17 = vsel %vm502_vm3, %v1259_v13, %v1260_v12  ;;  %v1058_v11 = vsub.s32 0, %v1043_v1  ;;  %vm1051_vm2 = vcmask 1042160  }
  0x8b   : > { %v1253_v18 = vpop.permute.xlu0 %1252  ;;  %1189 = vmatpush1.msk.msra.mxu0 %vm254_vm0, %v249_v16  ;;  %v1263_v19 = vpop.permute.xlu1 %1262  ;;  %1200 = vmatpush1.msk.msra.mxu1 %vm254_vm0, %v503_v17  ;;  %v1062_v16 = vsub.s32 1, %v1043_v1 }
  0x8c   : > { %v1255_v20 = vunpack.i.h.bf16 %v1253_v18  ;;  %v1254_v21 = vunpack.i.l.bf16 %v1253_v18  ;;  %1190 = vmatmul.mubr.msk.f32.vlgmr.msra.gmra.mxu0 %vm250_vm1, %v1187_v14  ;;  %v1265_v22 = vunpack.i.h.bf16 %v1263_v19  ;;  %v1264_v23 = vunpack.i.l.bf16 %v1263_v19  ;;  %1201 = vmatmul.mubr.msk.f32.vlgmr.msra.gmra.mxu1 %vm250_vm1, %v1198_v15 }
  0x8d   : > { %487 = vmatprep.mubr.f32.mxu0 %v1296_v0  ;;  %751 = vmatprep.mubr.f32.mxu1 %v1296_v0  ;;  %v1055_v14 = vsel %vm1054_vm10, 1, %v1303_v6  ;;  %v1306_v19 = vmov 1983009808  }
  0x8e   : > { %1195 = vmatprep.subr.msk.mxu0 %vm254_vm0, %v1255_v20  ;;  %v415_v25 = vsel %vm414_vm4, %v1254_v21, %v1255_v20  ;;  %v591_v26 = vsel %vm590_vm5, %v1264_v23, %v1265_v22  ;;  %v1040_v20 = vunpack.c.l.s4 %v1306_v19 }
  0x8f   : > { %1196 = vmatpush1.msk.msra.mxu0 %vm254_vm0, %v415_v25  ;;  %v1268_v27 = vpop.permute.xlu0 %1267  ;;  %v1273_v28 = vpop.permute.xlu1 %1272 }
  0x90   : > { %1197 = vmatmul.mubr.msk.f32.vlgmr.msra.gmra.mxu0 %vm250_vm1, %v1194_v24  ;;  %v1270_v29 = vunpack.i.h.bf16 %v1268_v27  ;;  %v1269_v30 = vunpack.i.l.bf16 %v1268_v27  ;;  %1203 = vmatprep.subr.msk.mxu0 %vm254_vm0, %v1265_v22  ;;  %v1275_v31 = vunpack.i.h.bf16 %v1273_v28  ;;  %v1274_v32 = vunpack.i.l.bf16 %v1273_v28 }
  0x91   : > { %1204 = vmatpush1.msk.msra.mxu0 %vm254_vm0, %v591_v26  ;;  %663 = vmatprep.mubr.f32.mxu0 %v1296_v0  ;;  %v1059_v24 = vrot.slane %v1055_v14, %v1058_v11  ;;  %v1063_v28 = vrot.slane %v1055_v14, %v1062_v16 }
  0x92   : > { %1207 = vmatprep.subr.msk.mxu1 %vm254_vm0, %v1270_v29  ;;  %v679_v35 = vsel %vm678_vm6, %v1269_v30, %v1270_v29  ;;  %1211 = vmatprep.subr.msk.mxu0 %vm254_vm0, %v1275_v31  ;;  %v767_v36 = vsel %vm766_vm7, %v1274_v32, %v1275_v31  ;;  %v1041_v30 = vunpack.c.0.s8 %v1040_v20 }
  0x93   : > { %v1278_v37 = vpop.permute.xlu0 %1277  ;;  %1208 = vmatpush1.msk.msra.mxu1 %vm254_vm0, %v679_v35  ;;  %v1283_v38 = vpop.permute.xlu1 %1282  ;;  %vm1064_vm11 = vcmp.eq.s32.totalorder %v1059_v24, 1  ;;  %vm1065_vm14 = vcmp.eq.s32.totalorder %v1063_v28, 1 }
  0x94   : > { %1205 = vmatmul.mubr.msk.f32.vlgmr.msra.gmra.mxu0 %vm250_vm1, %v1202_v33  ;;  %v1280_v39 = vunpack.i.h.bf16 %v1278_v37  ;;  %v1279_v40 = vunpack.i.l.bf16 %v1278_v37  ;;  %1209 = vmatmul.mubr.msk.f32.vlgmr.msra.gmra.mxu1 %vm250_vm1, %v1206_v34  ;;  %v1285_v41 = vunpack.i.h.bf16 %v1283_v38  ;;  %v1284_v42 = vunpack.i.l.bf16 %v1283_v38 }
  0x95   : > { %1212 = vmatpush1.msk.msra.mxu0 %vm254_vm0, %v767_v36  ;;  %839 = vmatprep.mubr.f32.mxu0 %v1296_v0  ;;  %v1044_v34 = vsub.s32 %v1041_v30, %v1043_v1 }
  0x96   : > { %1215 = vmatprep.subr.msk.mxu1 %vm254_vm0, %v1280_v39  ;;  %v855_v45 = vsel %vm854_vm8, %v1279_v40, %v1280_v39  ;;  %927 = vmatprep.mubr.f32.mxu1 %v1296_v0  ;;  %v943_v46 = vsel %vm942_vm9, %v1284_v42, %v1285_v41 }
  0x97   : > { %1216 = vmatpush1.msk.msra.mxu1 %vm254_vm0, %v855_v45  ;;  %1219 = vmatprep.subr.msk.mxu0 %vm254_vm0, %v1285_v41 }
  0x98   : > { %1213 = vmatmul.mubr.msk.f32.vlgmr.msra.gmra.mxu0 %vm250_vm1, %v1210_v43  ;;  %1217 = vmatmul.mubr.msk.f32.vlgmr.msra.gmra.mxu1 %vm250_vm1, %v1214_v44 }
  0x99   : > { %1220 = vmatpush1.msk.msra.mxu0 %vm254_vm0, %v943_v46  ;;  %1015 = vmatprep.mubr.f32.mxu0 %v1296_v0 }
  0x9c   : > { %1221 = vmatmul.mubr.msk.f32.vlgmr.msra.gmra.mxu0 %vm250_vm1, %v1218_v47  ;;  %vm1049_vm1 = vmor %vm1048_vm13, %vm1047_vm12 }
  0xa0   : > { %v1028_v21 = vpop.permute.xlu0 %1027 }
  0xd6   : > { %v403_v48 = vpop.f32.mrf.mxu1 }
  0xd8   : > { %v405_v49 = vpop.f32.mrf.mxu1 }
 0x14c   : > { %v325_v50 = vpop.f32.mrf.mxu0  ;;  %v577_v51 = vpop.f32.mrf.mxu1 }
 0x14d   : > { %v404_v53 = vadd.f32 %v403_v48, %v325_v50 }
 0x14e   : > { %v327_v52 = vpop.f32.mrf.mxu0  ;;  %v579_v55 = vpop.f32.mrf.mxu1 }
 0x14f   : > { %v406_v57 = vadd.f32 %v405_v49, %v327_v52 }
 0x150   : > { %v489_v54 = vpop.f32.mrf.mxu0 }
 0x151   : > { %v494_v58 = vadd.f32 %v489_v54, %v404_v53 }
 0x152   : > { %v491_v59 = vpop.f32.mrf.mxu0 }
 0x153   : > { %v495_v60 = vadd.f32 %v491_v59, %v406_v57  ;;  %v582_v61 = vadd.f32 %v577_v51, %v494_v58 }
 0x154   : > { %v665_v63 = vpop.f32.mrf.mxu0  ;;  %v753_v0 = vpop.f32.mrf.mxu1 }
 0x155   : > { %v583_v2 = vadd.f32 %v579_v55, %v495_v60  ;;  %v670_v3 = vadd.f32 %v665_v63, %v582_v61 }
 0x156   : > { %v667_v4 = vpop.f32.mrf.mxu0  ;;  %v755_v5 = vpop.f32.mrf.mxu1 }
 0x157   : > { %v671_v7 = vadd.f32 %v667_v4, %v583_v2  ;;  %v758_v8 = vadd.f32 %v753_v0, %v670_v3 }
 0x158   : > { %v841_v9 = vpop.f32.mrf.mxu0  ;;  %v929_v10 = vpop.f32.mrf.mxu1 }
 0x159   : > { %v759_v12 = vadd.f32 %v755_v5, %v671_v7  ;;  %v846_v13 = vadd.f32 %v841_v9, %v758_v8 }
 0x15a   : > { %v843_v15 = vpop.f32.mrf.mxu0  ;;  %v931_v22 = vpop.f32.mrf.mxu1 }
 0x15b   : > { %v847_v17 = vadd.f32 %v843_v15, %v759_v12  ;;  %v934_v18 = vadd.f32 %v929_v10, %v846_v13 }
 0x15c   : > { %v1017_v23 = vpop.f32.mrf.mxu0 }
 0x15d   : > { %v935_v25 = vadd.f32 %v931_v22, %v847_v17  ;;  %v1022_v26 = vadd.f32 %v1017_v23, %v934_v18 }
 0x15e   : > { %v1019_v27 = vpop.f32.mrf.mxu0 }
 0x15f   : > { %v1023_v29 = vadd.f32 %v1019_v27, %v935_v25  ;;  %v1030_v31 = vadd.f32 %v1028_v21, %v1022_v26 }
 0x161   : > { %v1031_v32 = vadd.f32 %v1028_v21, %v1023_v29  ;;  %v1032_v33 = vmax.f32 %v1030_v31, 0.0 }
 0x163   : > { %v1033_v35 = vmax.f32 %v1031_v32, 0.0  ;;  %v1066_v36 = vsel %vm1064_vm11, %v1032_v33, 0.0 }
 0x164   : > { %v1074_v37 = vmul.f32 %v1066_v36, %v1066_v36  ;;  %v1068_v40 = vsel %vm254_vm0, %v1066_v36, 0.0 }
 0x165   : > { %v1222_v38 = vpack.c.bf16 %v1033_v35, %v1032_v33  ;;  %v1067_v39 = vsel %vm1065_vm14, %v1033_v35, 0.0 }
 0x166   : > { %v1070_v41 = vsel %vm1069_vm15, %v1067_v39, 0.0  ;;  %v1075_v42 = vmul.f32 %v1067_v39, %v1067_v39  ;;  %v1076_v45 = vsel %vm254_vm0, %v1074_v37, 0.0 }
 0x167   : > { %v1045_v43 = vrot.slane %v1222_v38, %v1044_v34  ;;  %v1071_v44 = vadd.f32 %v1070_v41, %v1068_v40 }
 0x168   : > { %v1077_v46 = vsel %vm1069_vm15, %v1075_v42, 0.0 }
 0x169   : > { %1050 = vst.msk [vmem:[%s231_s9] sm:$0xf] %vm1049_vm1, %v1045_v43  ;;  %1072 = vadd.xlane.f32.xlu0 %v1071_v44  ;;  %v1078_v47 = vadd.f32 %v1077_v46, %v1076_v45 }
 0x16a   : > { %1052 = vst.msk [vmem:[%s231_s9 + $0x2] sm:$0x3] %vm1051_vm2, %v1303_v6 }
 0x16b   : > { %1079 = vadd.xlane.f32.xlu1 %v1078_v47 }
 0x1f2   : > { %v1073_v50 = vpop.xlane.xlu0 %1072 }
 0x1f4   : > { %v1080_v48 = vpop.xlane.xlu1 %1079 }
 0x1f5   : > { %v1082_v49 = vrot.slane %v1080_v48, 4 }
 0x1f7   : > { %v1084_v51 = vsel %vm254_vm0, %v1073_v50, %v1082_v49 }
 0x1f8   : > { %1087 = vperm.xlu1 %1287, %v1084_v51  }
 0x273   : > { %v1088_v52 = vpop.permute.xlu1 %1087 }
 0x274   : > { %1090 = vst [vmem:[%s235_s12] sm:$0xff] %v1088_v52 }
 0x275 PF: > { %s16_s18 = sadd.s32 1, %s1294_s18  }
 0x276   : > { %p13_p4 = scmp.ge.s32.totalorder %s16_s18, 4  }
 0x278   :  { %15 = sbr.rel (!%p13_p4) target bundleno = 1 (0x1), region = 86 }

</bundles_post_ra>
